<compile_context>
chip_gen: v7x
topology: tpu7x:2x2x1
jax: 0.10.0
libtpu: 0.0.40
codegen_flags: <defaults>
</compile_context>

<pallas_src>
import functools
import math

import numpy as np

import jax
import jax.numpy as jnp
from jax import lax
from jax.experimental import pallas as pl
from jax.experimental.pallas import tpu as pltpu


def _round_up(x, m):
    return ((x + m - 1) // m) * m


def _mse_onehot_kernel(pred_ref, tgt_ref, e_ref, cls_ref, out_ref, *,
                       n_valid_rows, tile_rows, need_mask, dot_precision):
    # pred_ref: (T, W)  predictions, lane-dense packed view (W = R*C, W % 128 == 0)
    # tgt_ref:  (T, R)  int32 class index per original sample (-1 for padding)
    # e_ref:    (R, W)  f32 constant, E[s, j] = 1.0 if j // C == s else 0.0
    # cls_ref:  (1, W)  f32 constant, cls[0, j] = j % C
    # out_ref:  (1, 1, W) f32 per-tile partial column sums
    pred = pred_ref[...].astype(jnp.float32)                      # (T, W)

    # Broadcast each sample's target across its C lanes with one small MXU
    # matmul (MXU is otherwise idle): tgt_rep[r, j] = tgt[r, j // C].
    tgt_rep = jnp.dot(tgt_ref[...].astype(jnp.float32), e_ref[...],
                      preferred_element_type=jnp.float32,
                      precision=dot_precision)                    # (T, W)

    # One-hot compare against the per-lane class id (exact for integer class
    # ids; out-of-range / -1 padding targets yield an all-zero one-hot row).
    onehot = (tgt_rep == cls_ref[...]).astype(jnp.float32)        # (T, W)
    diff = pred - onehot
    sq = diff * diff

    if need_mask:
        # Only compiled in when the last grid tile extends past the packed
        # array; OOB reads are unspecified, so select (never multiply).
        row = (jax.lax.broadcasted_iota(jnp.int32, sq.shape, 0)
               + pl.program_id(0) * tile_rows)
        sq = jnp.where(row < n_valid_rows, sq, 0.0)

    # Reduce only over the sublane (row) axis: vreg-wise VPU adds plus one tiny
    # sublane fold. The cross-lane / cross-tile reduction happens on the tiny
    # partials outside the kernel.
    out_ref[0] = jnp.sum(sq, axis=0, keepdims=True)               # (1, W)


def mse_loss_onehot(inputs, target, *, max_tile_rows=512):
    """MSE(inputs, onehot(target)) with 'mean' reduction, like nn.MSELoss().

    inputs: (B, C) float32 or bfloat16 predictions.
    target: (B, 1) or (B,) integer class indices. Indices outside [0, C)
            produce an all-zero one-hot row (PyTorch's scatter_-based one-hot
            would error instead).
    returns: scalar float32 loss.
    """
    B, C = inputs.shape
    target = jnp.asarray(target)
    if target.ndim == 2:
        target = target[:, 0]
    assert target.shape == (B,)
    target = target.astype(jnp.int32)
    if inputs.dtype not in (jnp.float32, jnp.bfloat16):
        inputs = inputs.astype(jnp.float32)

    # Lane-dense repack: view (B, C) as (N, W) with W = R*C a multiple of 128.
    R = 128 // math.gcd(C, 128)
    W = R * C

    pad = (-B) % R
    if pad:
        # TODO(synk): padding makes one extra copy of `inputs`; callers should
        # prefer batch sizes that are a multiple of R (= 64 for C = 10).
        inputs = jnp.pad(inputs, ((0, pad), (0, 0)))
        target = jnp.pad(target, (0, pad), constant_values=-1)
    n_rows = (B + pad) // R
    pred_packed = inputs.reshape(n_rows, W)    # free: merges adjacent dims
    tgt_packed = target.reshape(n_rows, R)

    # Row tiling over the packed view; typical batches are a single grid step.
    max_tile_rows = _round_up(max(int(max_tile_rows), 16), 16)
    if n_rows <= max_tile_rows:
        tile_rows, n_tiles, need_mask = n_rows, 1, False
    else:
        tile_rows = max_tile_rows
        n_tiles = pl.cdiv(n_rows, tile_rows)
        need_mask = (n_rows % tile_rows) != 0

    # Constants: E broadcasts each sample's target across its C lanes via the
    # MXU; cls is the class id of each packed lane.
    e_mat = jnp.asarray(
        (np.arange(W)[None, :] // C == np.arange(R)[:, None]).astype(np.float32))
    cls_row = jnp.asarray((np.arange(W) % C).astype(np.float32)[None, :])

    # Default MXU precision truncates f32 operands to bf16, which is exact for
    # integer class ids < 256; for larger C force the full-precision path.
    dot_precision = (lax.Precision.HIGHEST if C > 256 else lax.Precision.DEFAULT)

    kernel = functools.partial(
        _mse_onehot_kernel,
        n_valid_rows=n_rows, tile_rows=tile_rows,
        need_mask=need_mask, dot_precision=dot_precision)

    # VMEM: double-buffered pred/tgt blocks + constants + matmul/elementwise
    # intermediates, plus a modest margin (no 32 MiB floor; fits v7x's 64 MiB).
    itemsize = jnp.dtype(inputs.dtype).itemsize
    pred_blk = tile_rows * W * itemsize
    tgt_blk = tile_rows * R * 4
    const_bytes = R * W * 4 + W * 4
    interm = 4 * tile_rows * W * 4
    need = 2 * (pred_blk + tgt_blk) + 2 * const_bytes + interm + (2 << 20)
    vmem_limit = int(min(max(need, 4 << 20), 30 << 20))

    partials = pl.pallas_call(
        kernel,
        out_shape=jax.ShapeDtypeStruct((n_tiles, 1, W), jnp.float32),
        grid_spec=pltpu.PrefetchScalarGridSpec(
            num_scalar_prefetch=0,
            grid=(n_tiles,),
            in_specs=[
                pl.BlockSpec((tile_rows, W), lambda i: (i, 0)),
                pl.BlockSpec((tile_rows, R), lambda i: (i, 0)),
                pl.BlockSpec((R, W), lambda i: (0, 0)),
                pl.BlockSpec((1, W), lambda i: (0, 0)),
            ],
            out_specs=pl.BlockSpec((1, 1, W), lambda i: (i, 0, 0)),
        ),
        compiler_params=pltpu.CompilerParams(
            dimension_semantics=("parallel",),
            vmem_limit_bytes=vmem_limit),
    )(pred_packed, tgt_packed, e_mat, cls_row)

    # Tiny cross-tile / cross-lane reduction + mean outside the kernel (keeps
    # the grid axis "parallel" so v7x's second TensorCore can be used).
    return jnp.sum(partials) * jnp.float32(1.0 / (B * C))


def _reference(inputs, target):
    B, C = inputs.shape
    onehot = jax.nn.one_hot(jnp.asarray(target).reshape(B), C, dtype=jnp.float32)
    return jnp.mean((inputs.astype(jnp.float32) - onehot) ** 2)


if __name__ == "__main__":
    key = jax.random.PRNGKey(0)
    k1, k2, k3, k4, k5, k6 = jax.random.split(key, 6)

    # Case 1: SVHN-like shape (10 digit classes), B a multiple of R=64:
    # free lane-dense repack, single grid step.
    B, C = 64, 10
    inputs = jax.random.normal(k1, (B, C), dtype=jnp.float32)
    target = jax.random.randint(k2, (B, 1), 0, C, dtype=jnp.int32)
    loss = mse_loss_onehot(inputs, target)
    jax.block_until_ready(loss)
    ref = _reference(inputs, target)
    assert jnp.allclose(loss, ref, rtol=1e-5, atol=1e-6), (loss, ref)

    # Case 2: batch not a multiple of R exercises the padded-repack path.
    B2 = 100
    inputs2 = jax.random.normal(k3, (B2, C), dtype=jnp.float32)
    target2 = jax.random.randint(k4, (B2, 1), 0, C, dtype=jnp.int32)
    loss2 = mse_loss_onehot(inputs2, target2)
    jax.block_until_ready(loss2)
    ref2 = _reference(inputs2, target2)
    assert jnp.allclose(loss2, ref2, rtol=1e-5, atol=1e-6), (loss2, ref2)

    # Case 3: bf16 predictions, forced multi-tile grid with a partial last
    # tile (exercises the masked path and the "parallel" grid).
    B3 = 1088  # 17 packed rows of 64 samples
    inputs3 = jax.random.normal(k5, (B3, C), dtype=jnp.float32).astype(jnp.bfloat16)
    target3 = jax.random.randint(k6, (B3, 1), 0, C, dtype=jnp.int32)
    loss3 = mse_loss_onehot(inputs3, target3, max_tile_rows=16)
    jax.block_until_ready(loss3)
    ref3 = _reference(inputs3, target3)
    assert jnp.allclose(loss3, ref3, rtol=1e-4, atol=1e-5), (loss3, ref3)

    print("KERNEL_OK")
</pallas_src>

<mosaic_0001>
module attributes {stable_mosaic.version = 11 : i64} {
  func.func @_mse_onehot_kernel(%arg0: i32, %arg1: memref<1x640xf32, #tpu.memory_space<vmem>>, %arg2: memref<1x64xi32, #tpu.memory_space<vmem>>, %arg3: memref<64x640xf32, #tpu.memory_space<vmem>>, %arg4: memref<1x640xf32, #tpu.memory_space<vmem>>, %arg5: memref<1x1x640xf32, #tpu.memory_space<vmem>>) attributes {dimension_semantics = [#tpu.dimension_semantics<parallel>], iteration_bounds = array<i64: 1>, scalar_prefetch = 0 : i64, scratch_operands = 0 : i64, tpu.core_type = #tpu.core_type<tc>, window_params = [{transform_indices = @transform_0, window_bounds = array<i64: 1, 640>}, {transform_indices = @transform_1, window_bounds = array<i64: 1, 64>}, {pipeline_mode = #tpu.pipeline_mode<synchronous>, transform_indices = @transform_2, window_bounds = array<i64: 64, 640>}, {pipeline_mode = #tpu.pipeline_mode<synchronous>, transform_indices = @transform_3, window_bounds = array<i64: 1, 640>}, {transform_indices = @transform_4, window_bounds = array<i64: 1, 1, 640>}]} {
    %c0 = arith.constant 0 : index
    %c0_0 = arith.constant 0 : index
    %0 = vector.load %arg1[%c0, %c0_0] : memref<1x640xf32, #tpu.memory_space<vmem>>, vector<1x640xf32>
    %c0_1 = arith.constant 0 : index
    %c0_2 = arith.constant 0 : index
    %1 = vector.load %arg2[%c0_1, %c0_2] : memref<1x64xi32, #tpu.memory_space<vmem>>, vector<1x64xi32>
    %2 = arith.sitofp %1 : vector<1x64xi32> to vector<1x64xf32>
    %c0_3 = arith.constant 0 : index
    %c0_4 = arith.constant 0 : index
    %3 = vector.load %arg3[%c0_3, %c0_4] : memref<64x640xf32, #tpu.memory_space<vmem>>, vector<64x640xf32>
    %cst = arith.constant dense<0.000000e+00> : vector<1x640xf32>
    %4 = tpu.matmul %2, %3, %cst {dimension_numbers = #tpu.dot_dimension_numbers<[1], [0], [0], [1], [0, 0, 1, 1], [], []>} : vector<1x64xf32>, vector<64x640xf32>, vector<1x640xf32> -> vector<1x640xf32>
    %c0_5 = arith.constant 0 : index
    %c0_6 = arith.constant 0 : index
    %5 = vector.load %arg4[%c0_5, %c0_6] : memref<1x640xf32, #tpu.memory_space<vmem>>, vector<1x640xf32>
    %6 = arith.cmpf oeq, %4, %5 : vector<1x640xf32>
    %7 = arith.extui %6 : vector<1x640xi1> to vector<1x640xi32>
    %8 = arith.sitofp %7 : vector<1x640xi32> to vector<1x640xf32>
    %9 = arith.subf %0, %8 : vector<1x640xf32>
    %10 = arith.mulf %9, %9 : vector<1x640xf32>
    %cst_7 = arith.constant dense<0.000000e+00> : vector<640xf32>
    %11 = vector.multi_reduction <add>, %10, %cst_7 [0] : vector<1x640xf32> to vector<640xf32>
    %12 = vector.shape_cast %11 : vector<640xf32> to vector<1x640xf32>
    %c0_8 = arith.constant 0 : index
    %c0_9 = arith.constant 0 : index
    %c0_10 = arith.constant 0 : index
    %13 = vector.load %arg5[%c0_8, %c0_9, %c0_10] : memref<1x1x640xf32, #tpu.memory_space<vmem>>, vector<1x1x640xf32>
    %14 = vector.shape_cast %13 : vector<1x1x640xf32> to vector<1x640xf32>
    %15 = vector.shape_cast %12 : vector<1x640xf32> to vector<1x1x640xf32>
    tpu.vector_store %arg5[%c0_8, %c0_9, %c0_10], %15 {strides = array<i32>} : memref<1x1x640xf32, #tpu.memory_space<vmem>>, vector<1x1x640xf32>,
    return
  }
  func.func @transform_0(%arg0: i32) -> (i32, i32) {
    %c0_i32 = arith.constant 0 : i32
    %c0_i32_0 = arith.constant 0 : i32
    return %arg0, %c0_i32 : i32, i32
  }
  func.func @transform_1(%arg0: i32) -> (i32, i32) {
    %c0_i32 = arith.constant 0 : i32
    %c0_i32_0 = arith.constant 0 : i32
    return %arg0, %c0_i32 : i32, i32
  }
  func.func @transform_2(%arg0: i32) -> (i32, i32) {
    %c0_i32 = arith.constant 0 : i32
    %c0_i32_0 = arith.constant 0 : i32
    %c0_i32_1 = arith.constant 0 : i32
    return %c0_i32, %c0_i32_0 : i32, i32
  }
  func.func @transform_3(%arg0: i32) -> (i32, i32) {
    %c0_i32 = arith.constant 0 : i32
    %c0_i32_0 = arith.constant 0 : i32
    %c0_i32_1 = arith.constant 0 : i32
    return %c0_i32, %c0_i32_0 : i32, i32
  }
  func.func @transform_4(%arg0: i32) -> (i32, i32, i32) {
    %c0_i32 = arith.constant 0 : i32
    %c0_i32_0 = arith.constant 0 : i32
    %c0_i32_1 = arith.constant 0 : i32
    return %arg0, %c0_i32, %c0_i32_0 : i32, i32, i32
  }
}

</mosaic_0001>

<bundles_post_ra>
// kernel: tpu_custom_call.1
= control target key start
LH: loop header
LB: loop body
LE: loop exit
PB: predicated region body
PF: predicated region fallthrough
CT: control target
= control target key end

     0   :  { %9 = vsyncpa [#allocation3], 0  ;;  %s669_s0 = inlined_call_operand.hbm [shape: f32[1,640], index: 0, kind: input, shape index: {}]   ;;  %s670_s1 = inlined_call_operand.vmem [shape: s32[1,64], index: 1, kind: input, shape index: {}]   ;;  %s671_s2 = inlined_call_operand.hbm [shape: f32[64,640], index: 2, kind: input, shape index: {}]   ;;  %s672_s3 = inlined_call_operand.vmem [shape: f32[1,640], index: 3, kind: input, shape index: {}]   ;;  %s673_s4 = inlined_call_operand.hbm [shape: f32[1,1,640], index: 4, kind: output, shape index: {}]  }
   0x1   :  { %10 = vsyncpa [#allocation6], 0 }
   0x2   :  { %11 = vsyncpa [#allocation4], 0  ;;  %s575_s15 = smov [#allocation2]   ;;  %s576_s17 = smov [#allocation5]  }
   0x3   :  { %s18_s16 = sshll.u32 %s575_s15, 4  ;;  %s29_s18 = sshll.u32 %s576_s17, 4  ;;  %s19_s16 = int_to_ptr.vmem [resolvable:$true] %s18_s16  ;;  %s609_s18 = int_to_ptr.vmem [resolvable:$true] %s29_s18 }
   0x4   :  { %s503_s21 = scalar_lea.hbm %s669_s0, 80 }
   0x5   :  { %p504_p0 = scmp.ne.s32.totalorder %s669_s0, %s503_s21  ;;  %p507_p1 = scmp.lt.u32.totalorder %s503_s21, %s669_s0 }
   0x7   :  { %p509_p2 = pnand %p507_p1, %p504_p0 }
   0x9   :  { %512 = shalt.err (!%p509_p2)
}
   0xa   :  { %s513_s26 = scalar_lea.vmem %s19_s16, 80  ;;  %s517_s27 = scalar_lea.vmem %s19_s16, 96 }
   0xb   :  { %p514_p3 = scmp.ne.s32.totalorder %s19_s16, %s513_s26  ;;  %p518_p4 = scmp.lt.s32.totalorder %s19_s16, %s19_s16 }
   0xc   :  { %p519_p5 = scmp.lt.s32.totalorder %s517_s27, %s513_s26 }
   0xe   :  { %p520_p6 = por %p519_p5, %p518_p4 }
  0x10   :  { %p521_p7 = pnand %p520_p6, %p514_p3 }
  0x12   :  { %524 = shalt.err (!%p521_p7)
}
  0x13   :  { %21 = dma.hbm_to_vmem [thread:$0]  %s669_s0, 80, %s19_s16, [#allocation3]  }
  0x14   :  { %s525_s6 = scalar_lea.hbm %s671_s2, 5120 }
  0x15   :  { %p526_p8 = scmp.ne.s32.totalorder %s671_s2, %s525_s6  ;;  %p529_p9 = scmp.lt.u32.totalorder %s525_s6, %s671_s2 }
  0x17   :  { %p531_p10 = pnand %p529_p9, %p526_p8 }
  0x19   :  { %534 = shalt.err (!%p531_p10)
}
  0x1a   :  { %s535_s11 = scalar_lea.vmem %s609_s18, 5120  ;;  %p540_p12 = scmp.lt.s32.totalorder %s609_s18, %s609_s18 }
  0x1b   :  { %p536_p11 = scmp.ne.s32.totalorder %s609_s18, %s535_s11  ;;  %p541_p13 = scmp.lt.s32.totalorder %s535_s11, %s535_s11 }
  0x1d   :  { %p542_p0 = por %p541_p13, %p540_p12 }
  0x1f   :  { %p543_p1 = pnand %p542_p0, %p536_p11 }
  0x21   :  { %546 = shalt.err (!%p543_p1)
}
  0x22   :  { %s577_s0 = smov 640   ;;  %s578_s12 = smov 40  }
  0x23   :  { %35 = dma.hbm_to_vmem [thread:$0]  %s671_s2, 5120, %s609_s18, [#allocation6], %s577_s0, %s577_s0, %s578_s12  }
  0x24   :  { %569 = dma.done.wait [#allocation3], 80  }
  0x25   :  { %570 = vsyncadd [#allocation3], 4294967216 }
  0x26   :  { %571 = dma.done.wait [#allocation6], 5120  }
  0x27   :  { %572 = vsyncadd [#allocation6], 4294962176  ;;  %v579_v0 = vmov 0.0   ;;  %v48_v1 = vld [vmem:[#allocation5 + $0x8] sm:$0xff]  ;;  %v53_v2 = vld [vmem:[#allocation5 + $0x30] sm:$0xff]  ;;  %vm87_vm0 = vcmask 523264  }
  0x28   :  { %155 = vmatprep.mubr.f32.mxu0 %v579_v0  ;;  %226 = vmatprep.mubr.f32.mxu1 %v579_v0  ;;  %v50_v3 = vld [vmem:[#allocation5 + $0x18] sm:$0xff]  ;;  %v450_v4 = vpack.c.bf16 %v53_v2, %v48_v1  ;;  %v55_v5 = vld [vmem:[#allocation5 + $0x40] sm:$0xff]  ;;  %v52_v7 = vld [vmem:[#allocation5 + $0x28] sm:$0xff]  ;;  %v580_v54 = vmov 0.0|0.0   ;;  %vm581_vm1 = vmmov 0   ;;  %v305_v1 = vlaneseq }
  0x29   :  { %v47_v6 = vld [vmem:[#allocation5] sm:$0xff]  ;;  %v466_v8 = vpack.c.bf16 %v55_v5, %v50_v3  ;;  %v49_v10 = vld [vmem:[#allocation5 + $0x10] sm:$0xff]  ;;  %v54_v11 = vld [vmem:[#allocation5 + $0x38] sm:$0xff] }
  0x2a   :  { %v452_v9 = vpack.c.bf16 %v52_v7, %v47_v6  ;;  %v58_v12 = vld [vmem:[#allocation5 + $0x58] sm:$0xff]  ;;  %451 = vmatprep.subr.bf16.mxu0 %v450_v4  ;;  %v468_v13 = vpack.c.bf16 %v54_v11, %v49_v10  ;;  %v63_v14 = vld [vmem:[#allocation5 + $0x80] sm:$0xff]  ;;  %v60_v15 = vld [vmem:[#allocation5 + $0x68] sm:$0xff]  ;;  %v306_v2 = vshrl.u32 %v305_v1, 7  ;;  %v582_v7 = vmov 1966171168  }
  0x2b   :  { %v65_v16 = vld [vmem:[#allocation5 + $0x90] sm:$0xff]  ;;  %467 = vmatprep.subr.bf16.mxu1 %v466_v8  ;;  %v454_v17 = vpack.c.bf16 %v63_v14, %v58_v12  ;;  %v62_v20 = vld [vmem:[#allocation5 + $0x78] sm:$0xff]  ;;  %v59_v21 = vld [vmem:[#allocation5 + $0x60] sm:$0xff]  ;;  %v353_v8 = vunpack.c.l.s4 %v582_v7  ;;  %vm395_vm7 = vcmp.lt.s32.totalorder %v305_v1, 640 }
  0x2c   :  { %453 = vmatpush1.bf16.msra.mxu0 %v452_v9  ;;  %v470_v18 = vpack.c.bf16 %v65_v16, %v60_v15  ;;  %v57_v19 = vld [vmem:[#allocation5 + $0x50] sm:$0xff]  ;;  %469 = vmatpush1.bf16.msra.mxu1 %v468_v13  ;;  %v64_v23 = vld [vmem:[#allocation5 + $0x88] sm:$0xff]  ;;  %v70_v28 = vld [vmem:[#allocation5 + $0xb8] sm:$0xff]  ;;  %v307_v3 = vsub.s32 0, %v306_v2  ;;  %v315_v5 = vsub.s32 2, %v306_v2  ;;  %v311_v6 = vsub.s32 1, %v306_v2 }
  0x2d   :  { %v456_v22 = vpack.c.bf16 %v62_v20, %v57_v19  ;;  %v68_v24 = vld [vmem:[#allocation5 + $0xa8] sm:$0xff]  ;;  %v73_v25 = vld [vmem:[#allocation5 + $0xd0] sm:$0xff]  ;;  %455 = vmatprep.subr.bf16.mxu0 %v454_v17  ;;  %v472_v26 = vpack.c.bf16 %v64_v23, %v59_v21  ;;  %v75_v29 = vld [vmem:[#allocation5 + $0xe0] sm:$0xff]  ;;  %v319_v9 = vsub.s32 3, %v306_v2  ;;  %v354_v13 = vunpack.c.0.s8 %v353_v8 }
  0x2e   :  { %471 = vmatprep.subr.bf16.mxu1 %v470_v18  ;;  %v458_v27 = vpack.c.bf16 %v73_v25, %v68_v24  ;;  %v67_v30 = vld [vmem:[#allocation5 + $0xa0] sm:$0xff]  ;;  %v474_v31 = vpack.c.bf16 %v75_v29, %v70_v28  ;;  %v72_v32 = vld [vmem:[#allocation5 + $0xc8] sm:$0xff]  ;;  %v69_v33 = vld [vmem:[#allocation5 + $0xb0] sm:$0xff]  ;;  %v323_v29 = vsub.s32 4, %v306_v2 }
  0x2f   :  { %v74_v34 = vld [vmem:[#allocation5 + $0xd8] sm:$0xff]  ;;  %v460_v35 = vpack.c.bf16 %v72_v32, %v67_v30  ;;  %v83_v37 = vld [vmem:[#allocation5 + $0x120] sm:$0xff]  ;;  %v80_v38 = vld [vmem:[#allocation5 + $0x108] sm:$0xff]  ;;  %v357_v19 = vsub.s32 %v354_v13, %v306_v2 }
  0x30   :  { %457 = vmatpush1.bf16.msra.mxu0 %v456_v22  ;;  %v78_v36 = vld [vmem:[#allocation5 + $0xf8] sm:$0xff]  ;;  %473 = vmatpush1.bf16.msra.mxu1 %v472_v26  ;;  %v476_v39 = vpack.c.bf16 %v74_v34, %v69_v33  ;;  %v85_v41 = vld [vmem:[#allocation5 + $0x130] sm:$0xff]  ;;  %v79_v45 = vld [vmem:[#allocation5 + $0x100] sm:$0xff] }
  0x31   :  { %459 = vmatprep.subr.bf16.mxu0 %v458_v27  ;;  %v462_v40 = vpack.c.bf16 %v83_v37, %v78_v36  ;;  %v77_v42 = vld [vmem:[#allocation5 + $0xf0] sm:$0xff]  ;;  %v82_v43 = vld [vmem:[#allocation5 + $0x118] sm:$0xff]  ;;  %475 = vmatprep.subr.bf16.mxu1 %v474_v31  ;;  %v478_v44 = vpack.c.bf16 %v85_v41, %v80_v38  ;;  %v84_v46 = vld [vmem:[#allocation5 + $0x128] sm:$0xff] }
  0x32   :  { %v464_v47 = vpack.c.bf16 %v82_v43, %v77_v42  ;;  %v45_v48 = vld [vmem:[%s670_s1] sm:$0x1]  ;;  %v480_v49 = vpack.c.bf16 %v84_v46, %v79_v45  ;;  %v51_v50 = vld [vmem:[#allocation5 + $0x20] sm:$0xff]  ;;  %v56_v51 = vld [vmem:[#allocation5 + $0x48] sm:$0xff] }
  0x33   :  { %v46_v52 = vcvt.s32.f32 %v45_v48  ;;  %v483_v53 = vpack.c.bf16 %v56_v51, %v51_v50  ;;  %v61_v55 = vld [vmem:[#allocation5 + $0x70] sm:$0xff]  ;;  %v66_v56 = vld [vmem:[#allocation5 + $0x98] sm:$0xff]  ;;  %v71_v58 = vld [vmem:[#allocation5 + $0xc0] sm:$0xff] }
  0x34   :  { %461 = vmatpush1.bf16.msra.mxu0 %v460_v35  ;;  %477 = vmatpush1.bf16.msra.mxu1 %v476_v39  ;;  %v486_v57 = vpack.c.bf16 %v66_v56, %v61_v55  ;;  %v76_v59 = vld [vmem:[#allocation5 + $0xe8] sm:$0xff]  ;;  %v81_v61 = vld [vmem:[#allocation5 + $0x110] sm:$0xff]  ;;  %v86_v62 = vld [vmem:[#allocation5 + $0x138] sm:$0xff] }
  0x35   :  { %463 = vmatprep.subr.bf16.mxu0 %v462_v40  ;;  %479 = vmatprep.subr.bf16.mxu1 %v478_v44  ;;  %v489_v60 = vpack.c.bf16 %v76_v59, %v71_v58  ;;  %v492_v63 = vpack.c.bf16 %v86_v62, %v81_v61  ;;  %v303_v4 = vld [vmem:[%s672_s3] sm:$0x1f]  ;;  %s583_s3 = smov [#allocation7]  }
  0x36   :  { %v308_v10 = vrot.slane %v303_v4, %v307_v3  ;;  %v316_v11 = vrot.slane %v303_v4, %v315_v5  ;;  %v312_v12 = vrot.slane %v303_v4, %v311_v6  ;;  %v320_v14 = vrot.slane %v303_v4, %v319_v9  ;;  %v44_v37 = vld [vmem:[#allocation2] sm:$0x1f]  ;;  %s404_s17 = sshll.u32 %s583_s3, 4  ;;  %s405_s17 = int_to_ptr.vmem [resolvable:$true] %s404_s17 }
  0x37   :  { %v324_v30 = vrot.slane %v303_v4, %v323_v29  ;;  %s547_s18 = scalar_lea.vmem %s405_s17, 80  ;;  %s551_s19 = scalar_lea.vmem %s405_s17, 96 }
  0x38   :  { %465 = vmatpush1.bf16.msra.mxu0 %v464_v47  ;;  %481 = vmatpush1.bf16.msra.mxu1 %v480_v49  ;;  %p548_p2 = scmp.ne.s32.totalorder %s405_s17, %s547_s18  ;;  %p552_p3 = scmp.lt.s32.totalorder %s405_s17, %s405_s17 }
  0x39   :  { %482 = vmatprep.subr.bf16.mxu0 %v580_v54  ;;  %p553_p4 = scmp.lt.s32.totalorder %s551_s19, %s547_s18 }
  0x3b   :  { %414 = vmatmul.mubr.msk.f32.vlgmr.msra.gmra.mrb[0].mxu0 %vm87_vm0, %v46_v52  ;;  %415 = vmatmul.mubr.msk.f32.vlgmr.msra.gmra.mrb[0].mxu1 %vm87_vm0, %v46_v52  ;;  %p554_p5 = por %p553_p4, %p552_p3 }
  0x3c   :  { %484 = vmatpush3.bf16.msra.mxu0 %v483_v53  ;;  %447 = vmatprep.mubr.msk.f32.mxu0 %vm581_vm1, %v579_v0 }
  0x3d   :  { %485 = vmatprep.subr.bf16.mxu0 %v580_v54  ;;  %p555_p6 = pnand %p554_p5, %p548_p2 }
  0x40   :  { %487 = vmatpush3.bf16.msra.mxu0 %v486_v57 }
  0x41   :  { %488 = vmatprep.subr.bf16.mxu0 %v580_v54 }
  0x44   :  { %490 = vmatpush3.bf16.msra.mxu0 %v489_v60 }
  0x45   :  { %491 = vmatprep.subr.bf16.mxu0 %v580_v54 }
  0x48   :  { %493 = vmatpush3.bf16.msra.mxu0 %v492_v63 }
  0x4b   :  { %448 = vmatmul.mubr.msk.f32.vlgmr.msra.gmra.mrb[2].mxu0 %vm87_vm0, %v46_v52 }
 0x10e   :  { %v157_v15 = vpop.f32.mrb[0].mxu0  ;;  %v228_v16 = vpop.f32.mrb[0].mxu1 }
 0x10f   :  { %vm330_vm2 = vcmp.eq.f32.partialorder %v157_v15, %v308_v10  ;;  %v159_v17 = vpop.f32.mrb[1].mxu0  ;;  %vm332_vm3 = vcmp.eq.f32.partialorder %v228_v16, %v316_v11  ;;  %v230_v20 = vpop.f32.mrb[1].mxu1 }
 0x110   :  { %v417_v18 = vsel %vm330_vm2, 1.0, %v579_v0  ;;  %vm331_vm4 = vcmp.eq.f32.partialorder %v159_v17, %v312_v12  ;;  %v419_v21 = vsel %vm332_vm3, 1.0, %v579_v0  ;;  %vm333_vm5 = vcmp.eq.f32.partialorder %v230_v20, %v320_v14 }
 0x111   :  { %v418_v22 = vsel %vm331_vm4, 1.0, %v579_v0  ;;  %v420_v24 = vsel %vm333_vm5, 1.0, %v579_v0 }
 0x112   :  { %v350_v23 = vcombine.low %v417_v18, %v418_v22  ;;  %v351_v25 = vcombine.low %v419_v21, %v420_v24 }
 0x114   :  { %v358_v26 = vrot.slane %v350_v23, %v357_v19  ;;  %v365_v27 = vrot.slane %v351_v25, %v357_v19 }
 0x116   :  { %v373_v28 = vcombine.low %v358_v26, %v365_v27 }
 0x118   :  { %v380_v35 = vrot.slane %v373_v28, %v357_v19 }
 0x11e   :  { %v299_v31 = vpop.f32.mrb[2].mxu0 }
 0x11f   :  { %vm334_vm6 = vcmp.eq.f32.partialorder %v299_v31, %v324_v30  ;;  %v449_v32 = vpop.f32.mrb[3].mxu0 }
 0x120   :  { %v421_v33 = vsel %vm334_vm6, 1.0, %v579_v0 }
 0x121   :  { %v372_v34 = vrot.slane %v421_v33, %v357_v19 }
 0x123   :  { %v387_v36 = vrot.slane %v372_v34, %v357_v19 }
 0x125   :  { %v388_v38 = vcombine.low %v380_v35, %v387_v36 }
 0x127   :  { %v390_v39 = vsub.f32 %v44_v37, %v388_v38 }
 0x129   :  { %v391_v40 = vmul.f32 %v390_v39, %v390_v39 }
 0x12b   :  { %397 = vst.msk [vmem:[#allocation7] sm:$0x1f] %vm395_vm7, %v391_v40 }
 0x12c   :  { %558 = shalt.err (!%p555_p6)
}
 0x12d   :  { %s559_s22 = scalar_lea.hbm %s673_s4, 80 }
 0x12e   :  { %p560_p7 = scmp.ne.s32.totalorder %s673_s4, %s559_s22  ;;  %p563_p8 = scmp.lt.u32.totalorder %s559_s22, %s673_s4 }
 0x130   :  { %p565_p9 = pnand %p563_p8, %p560_p7 }
 0x132   :  { %568 = shalt.err (!%p565_p9)
}
 0x133   :  { %407 = dma.vmem_to_hbm [thread:$0]  %s405_s17, 80, %s673_s4, [#allocation4]  }
 0x134   :  { %573 = dma.done.wait [#allocation4], 80  }
 0x135   :  { %574 = vsyncadd [#allocation4], 4294967216 }
 0x136   :  { %411 = vsyncpa [#allocation3], 1 }
 0x137   :  { %412 = vsyncpa [#allocation6], 1 }
 0x138   :  { %413 = vsyncpa [#allocation4], 1 }

</bundles_post_ra>
